<compile_context>
chip_gen: v6e
topology: v6e:2x2x1
jax: 0.10.0
libtpu: 0.0.40
codegen_flags: <defaults>
</compile_context>

<pallas_src>
import functools

import jax
import jax.numpy as jnp
from jax import lax
from jax.experimental import pallas as pl
from jax.experimental.pallas import tpu as pltpu


def _conv_up_kernel(w_ref, b_ref, x_ref, o_ref, *, h, w):
    # w_ref: (9, C4, Cin)  fused per-tap weights, tap k = ky*3 + kx
    # b_ref: (C4, 1)       fused bias
    # x_ref: (Cin, H*W)    one batch element, spatial index p = i*W + j on lanes
    # o_ref: (C4, H*W)     fused conv1+deconv output (pre pixel-shuffle), ReLU'd
    cin, blk = x_ref.shape
    c4 = o_ref.shape[0]

    x = x_ref[...]

    # Per-lane (i, j) decode of the flattened spatial index (static shapes).
    pos = lax.broadcasted_iota(jnp.int32, (cin, blk), 1)
    if (w & (w - 1)) == 0:                      # power-of-two fast path
        j_idx = pos & (w - 1)
        i_idx = pos >> (w.bit_length() - 1)
    else:
        j_idx = pos % w
        i_idx = pos // w

    acc = jnp.zeros((c4, blk), jnp.float32)
    for k in range(9):
        dy = k // 3 - 1
        dx = k % 3 - 1
        if dy == 0 and dx == 0:
            tap = x
        else:
            d = dy * w + dx
            # tap[:, p] = x[:, p + d] for in-bounds neighbours, else 0.
            shifted = pltpu.roll(x, shift=(-d) % blk, axis=1)
            valid = None
            if dy == 1:
                valid = i_idx < (h - 1)
            elif dy == -1:
                valid = i_idx > 0
            if dx == 1:
                c = j_idx < (w - 1)
                valid = c if valid is None else (valid & c)
            elif dx == -1:
                c = j_idx > 0
                valid = c if valid is None else (valid & c)
            tap = jnp.where(valid, shifted, 0.0)
        acc = acc + jnp.dot(w_ref[k], tap, preferred_element_type=jnp.float32)

    o_ref[...] = jnp.maximum(acc + b_ref[...], 0.0)


def fuse_conv_up_params(w1, b1, w2, b2):
    """One-time algebraic fusion of Conv2d(3x3, pad=1) + ConvTranspose2d(2,2).

    Only valid for this ConvUpBlock configuration: norm='Identity' and the
    activation applied strictly AFTER conv2 (no nonlinearity between convs).
    Returns (w_taps, bf) to pass to conv_up_block_apply.
    """
    cmid, cin = w1.shape[0], w1.shape[1]
    co = w2.shape[1]
    assert w2.shape == (cmid, co, 2, 2), w2.shape
    k = 9 * cin
    c4 = 4 * co
    # w1_mat[(ky*3+kx)*Cin + ci, cm] = w1[cm, ci, ky, kx]
    w1_mat = jnp.transpose(w1, (2, 3, 1, 0)).reshape(k, cmid)
    # w2_mat[cm, (a*2+b)*Co + co] = w2[cm, co, a, b]
    w2_mat = jnp.transpose(w2, (0, 2, 3, 1)).reshape(cmid, c4)
    wt = (w1_mat @ w2_mat).T                                   # (C4, K)
    w_taps = wt.reshape(c4, 9, cin).transpose(1, 0, 2)         # (9, C4, Cin)
    bf = (b1 @ w2_mat + jnp.tile(b2, 4)).reshape(c4, 1)        # (C4, 1)
    return w_taps, bf


@jax.jit
def conv_up_block_apply(x_nchw, w_taps, bf):
    """x_nchw: (N, Cin, H, W) f32; w_taps/bf from fuse_conv_up_params.
    Returns NCHW output (N, Co, 2H, 2W)."""
    n, cin, h, w = x_nchw.shape
    c4 = w_taps.shape[1]
    co = c4 // 4
    blk = h * w
    m = n * blk
    assert blk % 128 == 0, "H*W must be a multiple of 128 for lane-dense blocks"

    # Single layout op: channel on sublanes, flattened spatial (n,i,j) on lanes.
    x_cm = jnp.transpose(x_nchw, (1, 0, 2, 3)).reshape(cin, m)

    out = pl.pallas_call(
        functools.partial(_conv_up_kernel, h=h, w=w),
        out_shape=jax.ShapeDtypeStruct((c4, m), jnp.float32),
        grid=(n,),
        in_specs=[
            pl.BlockSpec((9, c4, cin), lambda i: (0, 0, 0)),   # weights: resident
            pl.BlockSpec((c4, 1), lambda i: (0, 0)),           # bias: resident
            pl.BlockSpec((cin, blk), lambda i: (0, i)),        # one batch elem
        ],
        out_specs=pl.BlockSpec((c4, blk), lambda i: (0, i)),
        compiler_params=pltpu.CompilerParams(
            dimension_semantics=("parallel",)),
    )(w_taps, bf, x_cm)

    # Pixel-shuffle back to NCHW: rows = (a, b, co), cols = (n, i, j)
    # -> out[n, co, 2i+a, 2j+b]
    z = out.reshape(2, 2, co, n, h, w)
    z = jnp.transpose(z, (3, 2, 4, 0, 5, 1)).reshape(n, co, 2 * h, 2 * w)
    return z


def reference(x, w1, b1, w2, b2):
    """Pure-JAX NCHW reference for the same forward pass."""
    n, cin, h, w = x.shape
    cmid = w1.shape[0]
    co = w2.shape[1]
    xp = jnp.pad(x, ((0, 0), (0, 0), (1, 1), (1, 1)))
    y = jnp.zeros((n, cmid, h, w), jnp.float32)
    for dy in range(3):
        for dx in range(3):
            y = y + jnp.einsum('ncij,oc->noij',
                               xp[:, :, dy:dy + h, dx:dx + w], w1[:, :, dy, dx])
    y = y + b1[None, :, None, None]
    t = jnp.einsum('nchw,coab->nohawb', y, w2)
    z = t.reshape(n, co, 2 * h, 2 * w) + b2[None, :, None, None]
    return jnp.maximum(z, 0.0)


if __name__ == "__main__":
    N, CIN, COUT, H, W = 2, 8, 4, 16, 16   # in_channels > out_channels branch
    key = jax.random.PRNGKey(0)
    k0, k1, k2, k3, k4 = jax.random.split(key, 5)

    x = jax.random.normal(k0, (N, CIN, H, W), jnp.float32)
    # conv1: nn.Conv2d(CIN, COUT, 3, 1, 1, bias=True)
    w1 = jax.random.normal(k1, (COUT, CIN, 3, 3), jnp.float32) * (1.0 / (CIN * 9) ** 0.5)
    b1 = jax.random.normal(k2, (COUT,), jnp.float32) * 0.1
    # conv2: nn.ConvTranspose2d(COUT, COUT, 2, 2)
    w2 = jax.random.normal(k3, (COUT, COUT, 2, 2), jnp.float32) * (1.0 / (COUT * 4) ** 0.5)
    b2 = jax.random.normal(k4, (COUT,), jnp.float32) * 0.1

    # One-time parameter fusion (outside the per-call jitted path).
    w_taps, bf = fuse_conv_up_params(w1, b1, w2, b2)
    w_taps = jax.block_until_ready(w_taps)
    bf = jax.block_until_ready(bf)

    out = conv_up_block_apply(x, w_taps, bf)
    out = jax.block_until_ready(out)

    ref = reference(x, w1, b1, w2, b2)
    assert out.shape == (N, COUT, 2 * H, 2 * W), out.shape
    assert jnp.allclose(out, ref, atol=1e-4, rtol=1e-4), \
        float(jnp.max(jnp.abs(out - ref)))
    print("KERNEL_OK")
</pallas_src>

<mosaic_0001>
module attributes {stable_mosaic.version = 11 : i64} {
  func.func @_conv_up_kernel(%arg0: i32, %arg1: memref<9x16x8xf32, #tpu.memory_space<vmem>>, %arg2: memref<16x1xf32, #tpu.memory_space<vmem>>, %arg3: memref<8x256xf32, #tpu.memory_space<vmem>>, %arg4: memref<16x256xf32, #tpu.memory_space<vmem>>) attributes {dimension_semantics = [#tpu.dimension_semantics<parallel>], iteration_bounds = array<i64: 2>, scalar_prefetch = 0 : i64, scratch_operands = 0 : i64, tpu.core_type = #tpu.core_type<tc>, window_params = [{pipeline_mode = #tpu.pipeline_mode<synchronous>, transform_indices = @transform_0, window_bounds = array<i64: 9, 16, 8>}, {pipeline_mode = #tpu.pipeline_mode<synchronous>, transform_indices = @transform_1, window_bounds = array<i64: 16, 1>}, {transform_indices = @transform_2, window_bounds = array<i64: 8, 256>}, {transform_indices = @transform_3, window_bounds = array<i64: 16, 256>}]} {
    %c0 = arith.constant 0 : index
    %c0_0 = arith.constant 0 : index
    %0 = vector.load %arg3[%c0, %c0_0] : memref<8x256xf32, #tpu.memory_space<vmem>>, vector<8x256xf32>
    %1 = tpu.iota {dimensions = array<i32: 1>} : vector<8x256xi32>
    %c15_i32 = arith.constant 15 : i32
    %2 = vector.broadcast %c15_i32 : i32 to vector<8x256xi32>
    %3 = arith.andi %1, %2 : vector<8x256xi32>
    %c4_i32 = arith.constant 4 : i32
    %4 = vector.broadcast %c4_i32 : i32 to vector<8x256xi32>
    %5 = arith.shrsi %1, %4 : vector<8x256xi32>
    %cst = arith.constant 0.000000e+00 : f32
    %6 = vector.broadcast %cst : f32 to vector<16x256xf32>
    %c17_i32 = arith.constant 17 : i32
    %7 = tpu.dynamic_rotate %0 by %c17_i32 dim 1 : vector<8x256xf32>, i32 -> vector<8x256xf32>
    %c0_i32 = arith.constant 0 : i32
    %8 = vector.broadcast %c0_i32 : i32 to vector<8x256xi32>
    %9 = arith.cmpi sgt, %5, %8 : vector<8x256xi32>
    %c0_i32_1 = arith.constant 0 : i32
    %10 = vector.broadcast %c0_i32_1 : i32 to vector<8x256xi32>
    %11 = arith.cmpi sgt, %3, %10 : vector<8x256xi32>
    %12 = arith.andi %9, %11 : vector<8x256xi1>
    %cst_2 = arith.constant 0.000000e+00 : f32
    %13 = vector.broadcast %cst_2 : f32 to vector<8x256xf32>
    %14 = arith.select %12, %7, %13 : vector<8x256xi1>, vector<8x256xf32>
    %c0_3 = arith.constant 0 : index
    %c0_4 = arith.constant 0 : index
    %c0_5 = arith.constant 0 : index
    %15 = vector.load %arg1[%c0_3, %c0_4, %c0_5] : memref<9x16x8xf32, #tpu.memory_space<vmem>>, vector<1x16x8xf32>
    %16 = vector.shape_cast %15 : vector<1x16x8xf32> to vector<16x8xf32>
    %cst_6 = arith.constant dense<0.000000e+00> : vector<16x256xf32>
    %17 = tpu.matmul %16, %14, %cst_6 {dimension_numbers = #tpu.dot_dimension_numbers<[1], [0], [0], [1], [0, 0, 1, 1], [], []>} : vector<16x8xf32>, vector<8x256xf32>, vector<16x256xf32> -> vector<16x256xf32>
    %18 = arith.addf %6, %17 : vector<16x256xf32>
    %c16_i32 = arith.constant 16 : i32
    %19 = tpu.dynamic_rotate %0 by %c16_i32 dim 1 : vector<8x256xf32>, i32 -> vector<8x256xf32>
    %c0_i32_7 = arith.constant 0 : i32
    %20 = vector.broadcast %c0_i32_7 : i32 to vector<8x256xi32>
    %21 = arith.cmpi sgt, %5, %20 : vector<8x256xi32>
    %cst_8 = arith.constant 0.000000e+00 : f32
    %22 = vector.broadcast %cst_8 : f32 to vector<8x256xf32>
    %23 = arith.select %21, %19, %22 : vector<8x256xi1>, vector<8x256xf32>
    %c1 = arith.constant 1 : index
    %c0_9 = arith.constant 0 : index
    %c0_10 = arith.constant 0 : index
    %24 = vector.load %arg1[%c1, %c0_9, %c0_10] : memref<9x16x8xf32, #tpu.memory_space<vmem>>, vector<1x16x8xf32>
    %25 = vector.shape_cast %24 : vector<1x16x8xf32> to vector<16x8xf32>
    %cst_11 = arith.constant dense<0.000000e+00> : vector<16x256xf32>
    %26 = tpu.matmul %25, %23, %cst_11 {dimension_numbers = #tpu.dot_dimension_numbers<[1], [0], [0], [1], [0, 0, 1, 1], [], []>} : vector<16x8xf32>, vector<8x256xf32>, vector<16x256xf32> -> vector<16x256xf32>
    %27 = arith.addf %18, %26 : vector<16x256xf32>
    %c15_i32_12 = arith.constant 15 : i32
    %28 = tpu.dynamic_rotate %0 by %c15_i32_12 dim 1 : vector<8x256xf32>, i32 -> vector<8x256xf32>
    %c0_i32_13 = arith.constant 0 : i32
    %29 = vector.broadcast %c0_i32_13 : i32 to vector<8x256xi32>
    %30 = arith.cmpi sgt, %5, %29 : vector<8x256xi32>
    %c15_i32_14 = arith.constant 15 : i32
    %31 = vector.broadcast %c15_i32_14 : i32 to vector<8x256xi32>
    %32 = arith.cmpi slt, %3, %31 : vector<8x256xi32>
    %33 = arith.andi %30, %32 : vector<8x256xi1>
    %cst_15 = arith.constant 0.000000e+00 : f32
    %34 = vector.broadcast %cst_15 : f32 to vector<8x256xf32>
    %35 = arith.select %33, %28, %34 : vector<8x256xi1>, vector<8x256xf32>
    %c2 = arith.constant 2 : index
    %c0_16 = arith.constant 0 : index
    %c0_17 = arith.constant 0 : index
    %36 = vector.load %arg1[%c2, %c0_16, %c0_17] : memref<9x16x8xf32, #tpu.memory_space<vmem>>, vector<1x16x8xf32>
    %37 = vector.shape_cast %36 : vector<1x16x8xf32> to vector<16x8xf32>
    %cst_18 = arith.constant dense<0.000000e+00> : vector<16x256xf32>
    %38 = tpu.matmul %37, %35, %cst_18 {dimension_numbers = #tpu.dot_dimension_numbers<[1], [0], [0], [1], [0, 0, 1, 1], [], []>} : vector<16x8xf32>, vector<8x256xf32>, vector<16x256xf32> -> vector<16x256xf32>
    %39 = arith.addf %27, %38 : vector<16x256xf32>
    %c1_i32 = arith.constant 1 : i32
    %40 = tpu.dynamic_rotate %0 by %c1_i32 dim 1 : vector<8x256xf32>, i32 -> vector<8x256xf32>
    %c0_i32_19 = arith.constant 0 : i32
    %41 = vector.broadcast %c0_i32_19 : i32 to vector<8x256xi32>
    %42 = arith.cmpi sgt, %3, %41 : vector<8x256xi32>
    %cst_20 = arith.constant 0.000000e+00 : f32
    %43 = vector.broadcast %cst_20 : f32 to vector<8x256xf32>
    %44 = arith.select %42, %40, %43 : vector<8x256xi1>, vector<8x256xf32>
    %c3 = arith.constant 3 : index
    %c0_21 = arith.constant 0 : index
    %c0_22 = arith.constant 0 : index
    %45 = vector.load %arg1[%c3, %c0_21, %c0_22] : memref<9x16x8xf32, #tpu.memory_space<vmem>>, vector<1x16x8xf32>
    %46 = vector.shape_cast %45 : vector<1x16x8xf32> to vector<16x8xf32>
    %cst_23 = arith.constant dense<0.000000e+00> : vector<16x256xf32>
    %47 = tpu.matmul %46, %44, %cst_23 {dimension_numbers = #tpu.dot_dimension_numbers<[1], [0], [0], [1], [0, 0, 1, 1], [], []>} : vector<16x8xf32>, vector<8x256xf32>, vector<16x256xf32> -> vector<16x256xf32>
    %48 = arith.addf %39, %47 : vector<16x256xf32>
    %c4 = arith.constant 4 : index
    %c0_24 = arith.constant 0 : index
    %c0_25 = arith.constant 0 : index
    %49 = vector.load %arg1[%c4, %c0_24, %c0_25] : memref<9x16x8xf32, #tpu.memory_space<vmem>>, vector<1x16x8xf32>
    %50 = vector.shape_cast %49 : vector<1x16x8xf32> to vector<16x8xf32>
    %cst_26 = arith.constant dense<0.000000e+00> : vector<16x256xf32>
    %51 = tpu.matmul %50, %0, %cst_26 {dimension_numbers = #tpu.dot_dimension_numbers<[1], [0], [0], [1], [0, 0, 1, 1], [], []>} : vector<16x8xf32>, vector<8x256xf32>, vector<16x256xf32> -> vector<16x256xf32>
    %52 = arith.addf %48, %51 : vector<16x256xf32>
    %c255_i32 = arith.constant 255 : i32
    %53 = tpu.dynamic_rotate %0 by %c255_i32 dim 1 : vector<8x256xf32>, i32 -> vector<8x256xf32>
    %c15_i32_27 = arith.constant 15 : i32
    %54 = vector.broadcast %c15_i32_27 : i32 to vector<8x256xi32>
    %55 = arith.cmpi slt, %3, %54 : vector<8x256xi32>
    %cst_28 = arith.constant 0.000000e+00 : f32
    %56 = vector.broadcast %cst_28 : f32 to vector<8x256xf32>
    %57 = arith.select %55, %53, %56 : vector<8x256xi1>, vector<8x256xf32>
    %c5 = arith.constant 5 : index
    %c0_29 = arith.constant 0 : index
    %c0_30 = arith.constant 0 : index
    %58 = vector.load %arg1[%c5, %c0_29, %c0_30] : memref<9x16x8xf32, #tpu.memory_space<vmem>>, vector<1x16x8xf32>
    %59 = vector.shape_cast %58 : vector<1x16x8xf32> to vector<16x8xf32>
    %cst_31 = arith.constant dense<0.000000e+00> : vector<16x256xf32>
    %60 = tpu.matmul %59, %57, %cst_31 {dimension_numbers = #tpu.dot_dimension_numbers<[1], [0], [0], [1], [0, 0, 1, 1], [], []>} : vector<16x8xf32>, vector<8x256xf32>, vector<16x256xf32> -> vector<16x256xf32>
    %61 = arith.addf %52, %60 : vector<16x256xf32>
    %c241_i32 = arith.constant 241 : i32
    %62 = tpu.dynamic_rotate %0 by %c241_i32 dim 1 : vector<8x256xf32>, i32 -> vector<8x256xf32>
    %c15_i32_32 = arith.constant 15 : i32
    %63 = vector.broadcast %c15_i32_32 : i32 to vector<8x256xi32>
    %64 = arith.cmpi slt, %5, %63 : vector<8x256xi32>
    %c0_i32_33 = arith.constant 0 : i32
    %65 = vector.broadcast %c0_i32_33 : i32 to vector<8x256xi32>
    %66 = arith.cmpi sgt, %3, %65 : vector<8x256xi32>
    %67 = arith.andi %64, %66 : vector<8x256xi1>
    %cst_34 = arith.constant 0.000000e+00 : f32
    %68 = vector.broadcast %cst_34 : f32 to vector<8x256xf32>
    %69 = arith.select %67, %62, %68 : vector<8x256xi1>, vector<8x256xf32>
    %c6 = arith.constant 6 : index
    %c0_35 = arith.constant 0 : index
    %c0_36 = arith.constant 0 : index
    %70 = vector.load %arg1[%c6, %c0_35, %c0_36] : memref<9x16x8xf32, #tpu.memory_space<vmem>>, vector<1x16x8xf32>
    %71 = vector.shape_cast %70 : vector<1x16x8xf32> to vector<16x8xf32>
    %cst_37 = arith.constant dense<0.000000e+00> : vector<16x256xf32>
    %72 = tpu.matmul %71, %69, %cst_37 {dimension_numbers = #tpu.dot_dimension_numbers<[1], [0], [0], [1], [0, 0, 1, 1], [], []>} : vector<16x8xf32>, vector<8x256xf32>, vector<16x256xf32> -> vector<16x256xf32>
    %73 = arith.addf %61, %72 : vector<16x256xf32>
    %c240_i32 = arith.constant 240 : i32
    %74 = tpu.dynamic_rotate %0 by %c240_i32 dim 1 : vector<8x256xf32>, i32 -> vector<8x256xf32>
    %c15_i32_38 = arith.constant 15 : i32
    %75 = vector.broadcast %c15_i32_38 : i32 to vector<8x256xi32>
    %76 = arith.cmpi slt, %5, %75 : vector<8x256xi32>
    %cst_39 = arith.constant 0.000000e+00 : f32
    %77 = vector.broadcast %cst_39 : f32 to vector<8x256xf32>
    %78 = arith.select %76, %74, %77 : vector<8x256xi1>, vector<8x256xf32>
    %c7 = arith.constant 7 : index
    %c0_40 = arith.constant 0 : index
    %c0_41 = arith.constant 0 : index
    %79 = vector.load %arg1[%c7, %c0_40, %c0_41] : memref<9x16x8xf32, #tpu.memory_space<vmem>>, vector<1x16x8xf32>
    %80 = vector.shape_cast %79 : vector<1x16x8xf32> to vector<16x8xf32>
    %cst_42 = arith.constant dense<0.000000e+00> : vector<16x256xf32>
    %81 = tpu.matmul %80, %78, %cst_42 {dimension_numbers = #tpu.dot_dimension_numbers<[1], [0], [0], [1], [0, 0, 1, 1], [], []>} : vector<16x8xf32>, vector<8x256xf32>, vector<16x256xf32> -> vector<16x256xf32>
    %82 = arith.addf %73, %81 : vector<16x256xf32>
    %c239_i32 = arith.constant 239 : i32
    %83 = tpu.dynamic_rotate %0 by %c239_i32 dim 1 : vector<8x256xf32>, i32 -> vector<8x256xf32>
    %c15_i32_43 = arith.constant 15 : i32
    %84 = vector.broadcast %c15_i32_43 : i32 to vector<8x256xi32>
    %85 = arith.cmpi slt, %5, %84 : vector<8x256xi32>
    %c15_i32_44 = arith.constant 15 : i32
    %86 = vector.broadcast %c15_i32_44 : i32 to vector<8x256xi32>
    %87 = arith.cmpi slt, %3, %86 : vector<8x256xi32>
    %88 = arith.andi %85, %87 : vector<8x256xi1>
    %cst_45 = arith.constant 0.000000e+00 : f32
    %89 = vector.broadcast %cst_45 : f32 to vector<8x256xf32>
    %90 = arith.select %88, %83, %89 : vector<8x256xi1>, vector<8x256xf32>
    %c8 = arith.constant 8 : index
    %c0_46 = arith.constant 0 : index
    %c0_47 = arith.constant 0 : index
    %91 = vector.load %arg1[%c8, %c0_46, %c0_47] : memref<9x16x8xf32, #tpu.memory_space<vmem>>, vector<1x16x8xf32>
    %92 = vector.shape_cast %91 : vector<1x16x8xf32> to vector<16x8xf32>
    %cst_48 = arith.constant dense<0.000000e+00> : vector<16x256xf32>
    %93 = tpu.matmul %92, %90, %cst_48 {dimension_numbers = #tpu.dot_dimension_numbers<[1], [0], [0], [1], [0, 0, 1, 1], [], []>} : vector<16x8xf32>, vector<8x256xf32>, vector<16x256xf32> -> vector<16x256xf32>
    %94 = arith.addf %82, %93 : vector<16x256xf32>
    %c0_49 = arith.constant 0 : index
    %c0_50 = arith.constant 0 : index
    %95 = vector.load %arg2[%c0_49, %c0_50] : memref<16x1xf32, #tpu.memory_space<vmem>>, vector<16x1xf32>
    %96 = vector.broadcast %95 : vector<16x1xf32> to vector<16x256xf32>
    %97 = arith.addf %94, %96 : vector<16x256xf32>
    %cst_51 = arith.constant 0.000000e+00 : f32
    %98 = vector.broadcast %cst_51 : f32 to vector<16x256xf32>
    %99 = arith.maximumf %97, %98 : vector<16x256xf32>
    %c0_52 = arith.constant 0 : index
    %c0_53 = arith.constant 0 : index
    %100 = vector.load %arg4[%c0_52, %c0_53] : memref<16x256xf32, #tpu.memory_space<vmem>>, vector<16x256xf32>
    tpu.vector_store %arg4[%c0_52, %c0_53], %99 {strides = array<i32>} : memref<16x256xf32, #tpu.memory_space<vmem>>, vector<16x256xf32>,
    return
  }
  func.func @transform_0(%arg0: i32) -> (i32, i32, i32) {
    %c0_i32 = arith.constant 0 : i32
    %c0_i32_0 = arith.constant 0 : i32
    %c0_i32_1 = arith.constant 0 : i32
    %c0_i32_2 = arith.constant 0 : i32
    return %c0_i32, %c0_i32_0, %c0_i32_1 : i32, i32, i32
  }
  func.func @transform_1(%arg0: i32) -> (i32, i32) {
    %c0_i32 = arith.constant 0 : i32
    %c0_i32_0 = arith.constant 0 : i32
    %c0_i32_1 = arith.constant 0 : i32
    return %c0_i32, %c0_i32_0 : i32, i32
  }
  func.func @transform_2(%arg0: i32) -> (i32, i32) {
    %c0_i32 = arith.constant 0 : i32
    %c0_i32_0 = arith.constant 0 : i32
    return %c0_i32, %arg0 : i32, i32
  }
  func.func @transform_3(%arg0: i32) -> (i32, i32) {
    %c0_i32 = arith.constant 0 : i32
    %c0_i32_0 = arith.constant 0 : i32
    return %c0_i32, %arg0 : i32, i32
  }
}

</mosaic_0001>

<bundles_post_ra>
// kernel: conv_up_block_apply.1
= control target key start
LH: loop header
LB: loop body
LE: loop exit
PB: predicated region body
PF: predicated region fallthrough
CT: control target
= control target key end

     0   :  { %s1330_s12 = smov 0   ;;  %s1332_s13 = smov 0   ;;  %s1611_s0 = inlined_call_operand.vmem [shape: f32[9,16,8], index: 0, kind: input, shape index: {}]   ;;  %s1612_s1 = inlined_call_operand.vmem [shape: f32[16,1], index: 1, kind: input, shape index: {}]   ;;  %s1613_s2 = inlined_call_operand.vmem [shape: f32[8,512], index: 2, kind: input, shape index: {}]   ;;  %s1614_s3 = inlined_call_operand.vmem [shape: f32[16,512], index: 3, kind: output, shape index: {}]  }
   0x1   :  { %s1334_s14 = smov 0  }
   0x2 LB: > { %s1343_s15 = sadd.s32 4294967295, %s1298_s14   ;;  %s1345_s16 = sadd.s32 1, %s1298_s14   ;;  %s1298_s14 = sphi %s1334_s14, %s1634_s14   ;;  %s1294_s13 = sphi %s1332_s13, %s1633_s13   ;;  %s1290_s12 = sphi %s1330_s12, %s1632_s12  }
   0x3   : > { %s85_s17 = ssub.s32 %s1298_s14, %s1345_s16  ;;  %s88_s18 = sadd.s32 1, %s1294_s13 }
   0x4   : > { %p86_p0 = scmp.eq.s32.totalorder %s85_s17, 0  ;;  %p98_p1 = scmp.ne.s32.totalorder %s1294_s13, %s1290_s12 }
   0x5   : > { %p99_p2 = scmp.eq.s32.totalorder %s1343_s15, 1  ;;  %p1178_p3 = scmp.ge.s32.totalorder %s1298_s14, 1 }
   0x6   : > { %s1353_s19 = scalar_select %p86_p0, %s1294_s13, %s88_s18  }
   0x7   : > { %p1355_p4 = por %p99_p2, %p98_p1  ;;  %p138_p5 = scmp.lt.s32.totalorder %s1298_s14, 3 }
   0x9   : > { %p139_p6 = pnand %p1178_p3, %p138_p5 }
   0xa   : > { %s1180_s21 = sshll.u32 (!%p139_p6), %s1343_s15, 1  ;;  %s1301_s26 = smov (!%p139_p6), 17  }
   0xb   : > { %142 = sbr.rel (%p139_p6) target bundleno = 386 (0x182), region = 32  ;;  %p162_p7 = scmp.lt.s32.totalorder (!%p139_p6), %s1180_s21, 3 }
   0xc   : > { %s1302_s27 = smov (!%p139_p6), 16   ;;  %s1303_s28 = smov (!%p139_p6), 15  }
   0xd   : > { %s1304_s29 = smov (!%p139_p6), 1   ;;  %s1305_s30 = smov (!%p139_p6), 127  }
   0xe   : > { %s1306_s4 = smov (!%p139_p6), 113   ;;  %s1307_s5 = smov (!%p139_p6), 112  }
   0xf   : > { %s1308_s6 = smov (!%p139_p6), 111  }
  0x10   : > { %v1300_v0 = vmov 0.0   ;;  %s1636_s21 = smov (!%p162_p7, %s1180_s21), 3  ;;  %v1309_v3 = vmov 0   ;;  %v1067_v4 = vld [vmem:[%s1612_s1] sm:$0xff]  ;;  %v1068_v5 = vld [vmem:[%s1612_s1 + $0x8] sm:$0xff]  ;;  %v170_v6 = vlaneseq  ;;  %v1183_v24 = vld [vmem:[%s1611_s0 + $0x18] sm:$0xff] }
  0x11   : > { %283 = vmatprep.mubr.f32.mxu1 %v1300_v0  ;;  %277 = vmatprep.mubr.f32.mxu0 %v1300_v0  ;;  %s1181_s22 = sshll.u32 %s1636_s21, 3  ;;  %vm206_vm7 = vcmask 64512   ;;  %v1182_v26 = vld [vmem:[%s1611_s0 + $0x10] sm:$0xff]  ;;  %v192_v33 = vld [vmem:[%s1611_s0] sm:$0xff]  ;;  %v193_v39 = vld [vmem:[%s1611_s0 + $0x8] sm:$0xff]  ;;  %s1237_s7 = sshll.u32 (%p1355_p4), %s1343_s15, 4 }
  0x12   : > { %s165_s25 = scalar_lea.vmem %s1613_s2, %s1181_s22  ;;  %1274 = vset.pattern.permute.xlu0 %v1309_v3  ;;  %1275 = vset.pattern.permute.xlu1 %v1309_v3  ;;  %v1391_v7 = vand.u32 127, %v170_v6  ;;  %v1192_v34 = vld [vmem:[%s1611_s0 + $0x20] sm:$0xff]  ;;  %v1193_v40 = vld [vmem:[%s1611_s0 + $0x28] sm:$0xff]  ;;  %v1198_v46 = vld [vmem:[%s1611_s0 + $0x30] sm:$0xff]  ;;  %s1100_s10 = scalar_lea.vmem (%p1355_p4), %s1614_s3, %s1237_s7 }
  0x13   : > { %v1365_v1 = vld [vmem:[%s165_s25] sm:$0xff]  ;;  %v1369_v2 = vld [vmem:[%s165_s25 + $0x8] sm:$0xff]  ;;  %v1199_v53 = vld [vmem:[%s1611_s0 + $0x38] sm:$0xff] }
  0x14   : > { %177 = vrot.lane.b32.xlu1 %v1365_v1, %s1301_s26  ;;  %194 = vrot.lane.b32.xlu0 %v1365_v1, %s1302_s27  ;;  %v1394_v8 = vadd.s32 128, %v1391_v7  ;;  %v175_v11 = vshra.s32 %v1391_v7, 4  ;;  %v173_v12 = vand.u32 15, %v1391_v7  ;;  %vm198_vm1 = vcmp.lt.s32.totalorder %v1391_v7, 16  ;;  %v1204_v48 = vld [vmem:[%s1611_s0 + $0x40] sm:$0xff]  ;;  %v1205_v54 = vld [vmem:[%s1611_s0 + $0x48] sm:$0xff] }
  0x15   : > { %vm181_vm5 = vcmp.lt.s32.totalorder %v1391_v7, 17  ;;  %vm377_vm10 = vcmp.lt.s32.totalorder %v1391_v7, 15  ;;  %vm480_vm14 = vcmp.lt.s32.totalorder %v1391_v7, 1  ;;  %vm669_vm15 = vcmp.lt.s32.totalorder %v1391_v7, 127  ;;  %v1208_v58 = vld [vmem:[%s1611_s0 + $0x50] sm:$0xff]  ;;  %v1214_v60 = vld [vmem:[%s1611_s0 + $0x60] sm:$0xff] }
  0x16   : > { %v176_v9 = vshra.s32 %v1394_v8, 4  ;;  %v174_v10 = vand.u32 15, %v1394_v8  ;;  %vm1413_vm3 = vcmp.gt.s32.totalorder %v175_v11, 0  ;;  %vm1417_vm4 = vcmp.gt.s32.totalorder %v173_v12, 0  ;;  %v1215_v3 = vld [vmem:[%s1611_s0 + $0x68] sm:$0xff]  ;;  %v1221_v6 = vld [vmem:[%s1611_s0 + $0x78] sm:$0xff] }
  0x17   : > { %vm1433_vm9 = vcmp.lt.s32.totalorder %v173_v12, 15  ;;  %vm188_vm11 = vmand %vm1413_vm3, %vm1417_vm4 }
  0x18   : > { %179 = vrot.lane.b32.xlu1 %v1369_v2, %s1301_s26  ;;  %196 = vrot.lane.b32.xlu0 %v1369_v2, %s1302_s27  ;;  %vm1402_vm0 = vcmp.gt.s32.totalorder %v176_v9, 0  ;;  %vm1407_vm2 = vcmp.gt.s32.totalorder %v174_v10, 0  ;;  %vm1422_vm6 = vcmp.lt.s32.totalorder %v174_v10, 15  ;;  %vm382_vm13 = vmand %vm1413_vm3, %vm1433_vm9 }
  0x19   : > { %vm189_vm8 = vmand %vm1402_vm0, %vm1407_vm2 }
  0x1a   : > { %vm383_vm12 = vmand %vm1402_vm0, %vm1422_vm6 }
  0x1c   : > { %375 = vrot.lane.b32.xlu1 %v1369_v2, %s1303_s28  ;;  %373 = vrot.lane.b32.xlu0 %v1365_v1, %s1303_s28 }
  0x20   : > { %478 = vrot.lane.b32.xlu1 %v1369_v2, %s1304_s29  ;;  %476 = vrot.lane.b32.xlu0 %v1365_v1, %s1304_s29 }
  0x24   : > { %667 = vrot.lane.b32.xlu1 %v1369_v2, %s1305_s30  ;;  %665 = vrot.lane.b32.xlu0 %v1365_v1, %s1305_s30 }
  0x28   : > { %766 = vrot.lane.b32.xlu1 %v1369_v2, %s1306_s4  ;;  %764 = vrot.lane.b32.xlu0 %v1365_v1, %s1306_s4 }
  0x2c   : > { %869 = vrot.lane.b32.xlu1 %v1369_v2, %s1307_s5  ;;  %867 = vrot.lane.b32.xlu0 %v1365_v1, %s1307_s5  ;;  %s158_s5 = sand.u32 1, %s1290_s12  }
  0x30   : > { %968 = vrot.lane.b32.xlu1 %v1369_v2, %s1308_s6  ;;  %966 = vrot.lane.b32.xlu0 %v1365_v1, %s1308_s6  ;;  %s1179_s6 = sshll.u32 %s158_s5, 5 }
  0x31   : > { %s160_s12 = scalar_lea.vmem [#allocation2], %s1179_s6 }
  0x34   : > { %1071 = vperm.xlu0 %1274, %v1067_v4   ;;  %1076 = vperm.xlu1 %1275, %v1068_v5   ;;  %v1220_v4 = vld [vmem:[%s1611_s0 + $0x70] sm:$0xff]  ;;  %v1226_v5 = vld [vmem:[%s1611_s0 + $0x80] sm:$0xff] }
  0x86   : > { %v178_v13 = vpop.permute.xlu1 %177  ;;  %v195_v14 = vpop.permute.xlu0 %194 }
  0x8a   : > { %v180_v19 = vpop.permute.xlu1 %179  ;;  %v197_v20 = vpop.permute.xlu0 %196 }
  0x8b   : > { %v199_v22 = vsel %vm198_vm1, %v195_v14, %v197_v20  ;;  %v200_v23 = vsel %vm198_vm1, %v197_v20, %v195_v14  ;;  %v182_v27 = vsel %vm181_vm5, %v178_v13, %v180_v19  ;;  %v183_v28 = vsel %vm181_vm5, %v180_v19, %v178_v13 }
  0x8c   : > { %1184 = vmatprep.subr.msk.mxu0 %vm1402_vm0, %v199_v22  ;;  %1238 = vmatprep.subr.msk.mxu1 %vm1402_vm0, %v199_v22  ;;  %vm1496_vm0 = vcmp.lt.s32.totalorder %v176_v9, 15  ;;  %vm1502_vm1 = vcmp.lt.s32.totalorder %v175_v11, 15 }
  0x8d   : > { %1185 = vmatpush1.msk.msra.mxu0 %vm1413_vm3, %v200_v23  ;;  %1239 = vmatpush1.msk.msra.mxu1 %vm1413_vm3, %v200_v23  ;;  %vm768_vm3 = vcmp.lt.s32.totalorder %v1391_v7, 113  ;;  %vm774_vm5 = vmand %vm1496_vm0, %vm1407_vm2 }
  0x8e   : > { %v376_v29 = vpop.permute.xlu1 %375  ;;  %1187 = vmatmul.mubr.msk.f32.vlgmr.msra.gmra.mxu1 %vm206_vm7, %v1183_v24  ;;  %1188 = vmatprep.subr.msk.mxu1 %vm189_vm8, %v182_v27  ;;  %v374_v30 = vpop.permute.xlu0 %373  ;;  %vm773_vm8 = vmand %vm1502_vm1, %vm1417_vm4 }
  0x8f   : > { %v378_v31 = vsel %vm377_vm10, %v374_v30, %v376_v29  ;;  %v379_v32 = vsel %vm377_vm10, %v376_v29, %v374_v30  ;;  %1189 = vmatpush1.msk.msra.mxu1 %vm188_vm11, %v183_v28  ;;  %1186 = vmatmul.mubr.msk.f32.vlgmr.msra.gmra.mxu0 %vm206_vm7, %v1182_v26  ;;  %vm974_vm10 = vmand %vm1496_vm0, %vm1422_vm6 }
  0x90   : > { %1194 = vmatprep.subr.msk.mxu0 %vm383_vm12, %v378_v31  ;;  %360 = vmatprep.mubr.f32.mxu1 %v1300_v0  ;;  %vm973_vm11 = vmand %vm1502_vm1, %vm1433_vm9 }
  0x91   : > { %1195 = vmatpush1.msk.msra.mxu0 %vm382_vm13, %v379_v32  ;;  %459 = vmatprep.mubr.f32.mxu0 %v1300_v0 }
  0x92   : > { %v479_v35 = vpop.permute.xlu1 %478  ;;  %1190 = vmatmul.mubr.msk.f32.vlgmr.msra.gmra.mxu1 %vm206_vm7, %v192_v33  ;;  %v477_v36 = vpop.permute.xlu0 %476  ;;  %614 = vmatprep.subr.mxu0 %v1369_v2  ;;  %v1209_v2 = vld [vmem:[%s1611_s0 + $0x58] sm:$0xff] }
  0x93   : > { %v481_v37 = vsel %vm480_vm14, %v477_v36, %v479_v35  ;;  %v482_v38 = vsel %vm480_vm14, %v479_v35, %v477_v36  ;;  %1196 = vmatmul.mubr.msk.f32.vlgmr.msra.gmra.mxu0 %vm206_vm7, %v1192_v34  ;;  %366 = vmatprep.mubr.f32.mxu1 %v1300_v0 }
  0x94   : > { %1200 = vmatprep.subr.msk.mxu1 %vm1407_vm2, %v481_v37  ;;  %465 = vmatprep.mubr.f32.mxu0 %v1300_v0  ;;  %vm871_vm2 = vcmp.lt.s32.totalorder %v1391_v7, 112 }
  0x95   : > { %1201 = vmatpush1.msk.msra.mxu1 %vm1417_vm4, %v482_v38  ;;  %615 = vmatpush1.msra.mxu0 %v1365_v1  ;;  %vm970_vm4 = vcmp.lt.s32.totalorder %v1391_v7, 111  ;;  %v1227_v7 = vld [vmem:[%s1611_s0 + $0x88] sm:$0xff] }
  0x96   : > { %1191 = vmatmul.mubr.msk.f32.gmra.mxu1 %vm206_vm7, %v193_v39  ;;  %v668_v41 = vpop.permute.xlu1 %667  ;;  %v666_v42 = vpop.permute.xlu0 %665 }
  0x97   : > { %v671_v45 = vsel %vm669_vm15, %v668_v41, %v666_v42  ;;  %1197 = vmatmul.mubr.msk.f32.gmra.mxu0 %vm206_vm7, %v1193_v40  ;;  %558 = vmatprep.mubr.f32.mxu1 %v1300_v0  ;;  %v670_v47 = vsel %vm669_vm15, %v666_v42, %v668_v41 }
  0x98   : > { %1210 = vmatprep.subr.msk.mxu1 %vm1422_vm6, %v671_v45  ;;  %648 = vmatprep.mubr.f32.mxu0 %v1300_v0 }
  0x9a   : > { %1202 = vmatmul.mubr.msk.f32.vlgmr.msra.gmra.mxu1 %vm206_vm7, %v1198_v46  ;;  %v767_v49 = vpop.permute.xlu1 %766  ;;  %v765_v50 = vpop.permute.xlu0 %764 }
  0x9b   : > { %1211 = vmatpush1.msk.msra.mxu1 %vm1433_vm9, %v670_v47  ;;  %v769_v51 = vsel %vm768_vm3, %v765_v50, %v767_v49  ;;  %v770_v52 = vsel %vm768_vm3, %v767_v49, %v765_v50  ;;  %1206 = vmatmul.mubr.msk.f32.vlgmr.msra.gmra.mxu0 %vm206_vm7, %v1204_v48 }
  0x9c   : > { %564 = vmatprep.mubr.f32.mxu1 %v1300_v0  ;;  %1216 = vmatprep.subr.msk.mxu0 %vm774_vm5, %v770_v52 }
  0x9d   : > { %1217 = vmatpush1.msk.msra.mxu0 %vm773_vm8, %v769_v51  ;;  %654 = vmatprep.mubr.f32.mxu0 %v1300_v0 }
  0x9e   : > { %1203 = vmatmul.mubr.msk.f32.gmra.mxu1 %vm206_vm7, %v1199_v53  ;;  %v870_v55 = vpop.permute.xlu1 %869  ;;  %v868_v56 = vpop.permute.xlu0 %867 }
  0x9f   : > { %v873_v57 = vsel %vm871_vm2, %v870_v55, %v868_v56  ;;  %1207 = vmatmul.mubr.msk.f32.gmra.mxu0 %vm206_vm7, %v1205_v54  ;;  %747 = vmatprep.mubr.f32.mxu1 %v1300_v0  ;;  %v872_v59 = vsel %vm871_vm2, %v868_v56, %v870_v55 }
  0xa0   : > { %1222 = vmatprep.subr.msk.mxu1 %vm1496_vm0, %v873_v57  ;;  %850 = vmatprep.mubr.f32.mxu0 %v1300_v0 }
  0xa2   : > { %1212 = vmatmul.mubr.msk.f32.vlgmr.msra.gmra.mxu1 %vm206_vm7, %v1208_v58  ;;  %v969_v61 = vpop.permute.xlu1 %968  ;;  %v967_v62 = vpop.permute.xlu0 %966 }
  0xa3   : > { %1223 = vmatpush1.msk.msra.mxu1 %vm1502_vm1, %v872_v59  ;;  %v971_v63 = vsel %vm970_vm4, %v967_v62, %v969_v61  ;;  %v972_v1 = vsel %vm970_vm4, %v969_v61, %v967_v62  ;;  %1218 = vmatmul.mubr.msk.f32.vlgmr.msra.gmra.mxu0 %vm206_vm7, %v1214_v60 }
  0xa4   : > { %753 = vmatprep.mubr.f32.mxu1 %v1300_v0  ;;  %1228 = vmatprep.subr.msk.mxu0 %vm974_vm10, %v972_v1 }
  0xa5   : > { %1229 = vmatpush1.msk.msra.mxu0 %vm973_vm11, %v971_v63  ;;  %856 = vmatprep.mubr.f32.mxu0 %v1300_v0 }
  0xa6   : > { %1213 = vmatmul.mubr.msk.f32.gmra.mxu1 %vm206_vm7, %v1209_v2 }
  0xa7   : > { %1219 = vmatmul.mubr.msk.f32.gmra.mxu0 %vm206_vm7, %v1215_v3  ;;  %949 = vmatprep.mubr.f32.mxu1 %v1300_v0 }
  0xa8   : > { %1050 = vmatprep.mubr.f32.mxu0 %v1300_v0 }
  0xaa   : > { %1224 = vmatmul.mubr.msk.f32.vlgmr.msra.gmra.mxu1 %vm206_vm7, %v1220_v4 }
  0xab   : > { %1230 = vmatmul.mubr.msk.f32.vlgmr.msra.gmra.mxu0 %vm206_vm7, %v1226_v5  ;;  %955 = vmatprep.mubr.f32.mxu1 %v1300_v0 }
  0xac   : > { %1056 = vmatprep.mubr.f32.mxu0 %v1300_v0 }
  0xae   : > { %1225 = vmatmul.mubr.msk.f32.gmra.mxu1 %vm206_vm7, %v1221_v6 }
  0xaf   : > { %1231 = vmatmul.mubr.msk.f32.gmra.mxu0 %vm206_vm7, %v1227_v7  ;;  %v1072_v61 = vpop.permute.xlu0 %1071 }
 0x14e   : > { %v285_v8 = vpop.f32.mrf.mxu1 }
 0x14f   : > { %v279_v9 = vpop.f32.mrf.mxu0 }
 0x150   : > { %v287_v10 = vpop.f32.mrf.mxu1 }
 0x151   : > { %v281_v11 = vpop.f32.mrf.mxu0 }
 0x152   : > { %v362_v12 = vpop.f32.mrf.mxu1 }
 0x153   : > { %v461_v13 = vpop.f32.mrf.mxu0  ;;  %v363_v0 = vadd.f32 %v362_v12, %v279_v9 }
 0x154   : > { %v364_v14 = vpop.f32.mrf.mxu1 }
 0x155   : > { %v463_v15 = vpop.f32.mrf.mxu0  ;;  %v365_v21 = vadd.f32 %v364_v14, %v281_v11  ;;  %v472_v24 = vadd.f32 %v461_v13, %v363_v0 }
 0x156   : > { %v368_v16 = vpop.f32.mrf.mxu1 }
 0x157   : > { %v467_v17 = vpop.f32.mrf.mxu0  ;;  %v369_v25 = vadd.f32 %v368_v16, %v285_v8  ;;  %v473_v28 = vadd.f32 %v463_v15, %v365_v21 }
 0x158   : > { %v370_v18 = vpop.f32.mrf.mxu1 }
 0x159   : > { %v469_v19 = vpop.f32.mrf.mxu0  ;;  %v371_v29 = vadd.f32 %v370_v18, %v287_v10  ;;  %v474_v33 = vadd.f32 %v467_v17, %v369_v25  ;;  %v1077_v10 = vpop.permute.xlu1 %1076 }
 0x15a   : > { %v560_v20 = vpop.f32.mrf.mxu1 }
 0x15b   : > { %v650_v22 = vpop.f32.mrf.mxu0  ;;  %v571_v30 = vadd.f32 %v560_v20, %v472_v24  ;;  %v475_v37 = vadd.f32 %v469_v19, %v371_v29 }
 0x15c   : > { %v562_v23 = vpop.f32.mrf.mxu1 }
 0x15d   : > { %v652_v26 = vpop.f32.mrf.mxu0  ;;  %v572_v34 = vadd.f32 %v562_v23, %v473_v28  ;;  %v661_v38 = vadd.f32 %v650_v22, %v571_v30 }
 0x15e   : > { %v566_v27 = vpop.f32.mrf.mxu1 }
 0x15f   : > { %v656_v31 = vpop.f32.mrf.mxu0  ;;  %v573_v39 = vadd.f32 %v566_v27, %v474_v33  ;;  %v662_v42 = vadd.f32 %v652_v26, %v572_v34 }
 0x160   : > { %v568_v32 = vpop.f32.mrf.mxu1 }
 0x161   : > { %v658_v35 = vpop.f32.mrf.mxu0  ;;  %v574_v43 = vadd.f32 %v568_v32, %v475_v37  ;;  %v663_v47 = vadd.f32 %v656_v31, %v573_v39 }
 0x162   : > { %v749_v36 = vpop.f32.mrf.mxu1 }
 0x163   : > { %v852_v40 = vpop.f32.mrf.mxu0  ;;  %v760_v44 = vadd.f32 %v749_v36, %v661_v38  ;;  %v664_v51 = vadd.f32 %v658_v35, %v574_v43 }
 0x164   : > { %v751_v41 = vpop.f32.mrf.mxu1 }
 0x165   : > { %v854_v45 = vpop.f32.mrf.mxu0  ;;  %v761_v48 = vadd.f32 %v751_v41, %v662_v42  ;;  %v863_v52 = vadd.f32 %v852_v40, %v760_v44 }
 0x166   : > { %v755_v46 = vpop.f32.mrf.mxu1 }
 0x167   : > { %v858_v49 = vpop.f32.mrf.mxu0  ;;  %v762_v53 = vadd.f32 %v755_v46, %v663_v47  ;;  %v864_v56 = vadd.f32 %v854_v45, %v761_v48 }
 0x168   : > { %v757_v50 = vpop.f32.mrf.mxu1 }
 0x169   : > { %v860_v54 = vpop.f32.mrf.mxu0  ;;  %v763_v57 = vadd.f32 %v757_v50, %v664_v51  ;;  %v865_v62 = vadd.f32 %v858_v49, %v762_v53 }
 0x16a   : > { %v951_v55 = vpop.f32.mrf.mxu1 }
 0x16b   : > { %v962_v58 = vadd.f32 %v951_v55, %v863_v52  ;;  %v1052_v59 = vpop.f32.mrf.mxu0  ;;  %v866_v4 = vadd.f32 %v860_v54, %v763_v57 }
 0x16c   : > { %v953_v60 = vpop.f32.mrf.mxu1 }
 0x16d   : > { %v963_v63 = vadd.f32 %v953_v60, %v864_v56  ;;  %v1063_v1 = vadd.f32 %v1052_v59, %v962_v58  ;;  %v1054_v2 = vpop.f32.mrf.mxu0 }
 0x16e   : > { %v957_v3 = vpop.f32.mrf.mxu1 }
 0x16f   : > { %v964_v5 = vadd.f32 %v957_v3, %v865_v62  ;;  %v1064_v6 = vadd.f32 %v1054_v2, %v963_v63  ;;  %v1079_v7 = vadd.f32 %v1072_v61, %v1063_v1  ;;  %v1058_v8 = vpop.f32.mrf.mxu0 }
 0x170   : > { %v959_v9 = vpop.f32.mrf.mxu1 }
 0x171   : > { %v1080_v11 = vadd.f32 %v1072_v61, %v1064_v6  ;;  %v1083_v12 = vmax.f32 %v1079_v7, 0.0  ;;  %v965_v13 = vadd.f32 %v959_v9, %v866_v4  ;;  %v1065_v14 = vadd.f32 %v1058_v8, %v964_v5  ;;  %v1060_v15 = vpop.f32.mrf.mxu0 }
 0x173   : > { %v1084_v16 = vmax.f32 %v1080_v11, 0.0  ;;  %1087 = vst [vmem:[%s160_s12] sm:$0xff] %v1083_v12  ;;  %v1081_v17 = vadd.f32 %v1077_v10, %v1065_v14  ;;  %v1066_v18 = vadd.f32 %v1060_v15, %v965_v13 }
 0x175   : > { %1088 = vst [vmem:[%s160_s12 + $0x8] sm:$0xff] %v1084_v16  ;;  %v1085_v0 = vmax.f32 %v1081_v17, 0.0  ;;  %v1082_v19 = vadd.f32 %v1077_v10, %v1066_v18  ;;  %1097 = sbr.rel (!%p1355_p4) target bundleno = 386 (0x182), region = 36 }
 0x177   : > { %1089 = vst [vmem:[%s160_s12 + $0x10] sm:$0xff] %v1085_v0  ;;  %v1086_v20 = vmax.f32 %v1082_v19, 0.0 }
 0x179   : > { %1090 = vst [vmem:[%s160_s12 + $0x18] sm:$0xff] %v1086_v20 }
 0x17a   : > { %v1113_v21 = vld [vmem:[%s160_s12] sm:$0xff] }
 0x17b   : > { %1114 = vst [vmem:[%s1100_s10] sm:$0xff] %v1113_v21 }
 0x17c   : > { %v1115_v22 = vld [vmem:[%s160_s12 + $0x8] sm:$0xff] }
 0x17d   : > { %1116 = vst [vmem:[%s1100_s10 + $0x8] sm:$0xff] %v1115_v22 }
 0x17e   : > { %v1117_v23 = vld [vmem:[%s160_s12 + $0x10] sm:$0xff] }
 0x17f   : > { %1118 = vst [vmem:[%s1100_s10 + $0x20] sm:$0xff] %v1117_v23 }
 0x180   : > { %v1119_v24 = vld [vmem:[%s160_s12 + $0x18] sm:$0xff] }
 0x181   : > { %1120 = vst [vmem:[%s1100_s10 + $0x28] sm:$0xff] %v1119_v24 }
 0x182 PF: > { %p10_p8 = scmp.ge.s32.totalorder %s1345_s16, 4   ;;  %s1632_s12 = smov %s1294_s13 }
 0x183   : > { %s1633_s13 = smov %s1353_s19  ;;  %s1634_s14 = smov %s1345_s16 }
 0x184   :  { %12 = sbr.rel (!%p10_p8) target bundleno = 2 (0x2), region = 93 }

</bundles_post_ra>
